<compile_context>
chip_gen: v6e
topology: v6e:2x2x1
jax: 0.10.0
libtpu: 0.0.40
codegen_flags: <defaults>
</compile_context>

<pallas_src>
import functools

import jax
import jax.numpy as jnp
from jax.experimental import pallas as pl
from jax.experimental.pallas import tpu as pltpu


# ----------------------------------------------------------------------------
# helpers
# ----------------------------------------------------------------------------
def round_up(x, m):
    return ((x + m - 1) // m) * m


def _pick_tk(K):
    """Largest K-tile in {512,384,256,128} that divides round_up(K,128)."""
    kp = round_up(K, 128)
    for tk in (512, 384, 256, 128):
        if kp % tk == 0:
            return tk
    return 128


def _pick_tm(M):
    """Largest M-tile in {256,...,8} that divides round_up(M,8) (no M padding)."""
    mp = round_up(M, 8)
    for tm in (256, 128, 64, 32, 16, 8):
        if mp % tm == 0:
            return tm
    return 8


# ----------------------------------------------------------------------------
# Pallas kernel 1: fused matmul + per-channel bias (+ residual) (+ ReLU)
#   y = relu( x @ W_folded + bias [+ identity] )          (BN scale folded into W)
# bf16 operands, f32 accumulator, f32 epilogue, bf16 output.
# Grid = (N_blocks, M_blocks, K_blocks); K is innermost "arbitrary" (accumulator).
# ----------------------------------------------------------------------------
def _mm_bias_kernel(x_ref, w_ref, b_ref, o_ref, acc_ref, *, relu):
    @pl.when(pl.program_id(2) == 0)
    def _():
        acc_ref[...] = jnp.zeros_like(acc_ref)

    acc_ref[...] += jnp.dot(x_ref[...], w_ref[...],
                            preferred_element_type=jnp.float32)

    @pl.when(pl.program_id(2) == pl.num_programs(2) - 1)
    def _():
        y = acc_ref[...] + b_ref[...]
        if relu:
            y = jnp.maximum(y, 0.0)
        o_ref[...] = y.astype(o_ref.dtype)


def _mm_bias_res_kernel(x_ref, w_ref, b_ref, r_ref, o_ref, acc_ref, *, relu):
    @pl.when(pl.program_id(2) == 0)
    def _():
        acc_ref[...] = jnp.zeros_like(acc_ref)

    acc_ref[...] += jnp.dot(x_ref[...], w_ref[...],
                            preferred_element_type=jnp.float32)

    @pl.when(pl.program_id(2) == pl.num_programs(2) - 1)
    def _():
        y = acc_ref[...] + b_ref[...] + r_ref[...].astype(jnp.float32)
        if relu:
            y = jnp.maximum(y, 0.0)
        o_ref[...] = y.astype(o_ref.dtype)


def fused_matmul_bias(x, wd, *, relu, residual=None):
    """x:[M,K] (any float dtype), wd: prepped weight dict -> [M,N] bf16."""
    M, K = x.shape
    Kp, Np = wd['w'].shape
    tk, tn = wd['tk'], wd['tn']
    tm = _pick_tm(M)
    Mp = round_up(M, tm)

    xp = jnp.pad(x.astype(jnp.bfloat16), ((0, Mp - M), (0, Kp - K)))

    in_specs = [
        pl.BlockSpec((tm, tk), lambda j, i, k: (i, k)),
        pl.BlockSpec((tk, tn), lambda j, i, k: (k, j)),
        pl.BlockSpec((1, tn), lambda j, i, k: (0, j)),
    ]
    args = [xp, wd['w'], wd['b']]

    if residual is not None:
        rp = jnp.pad(residual.astype(jnp.bfloat16),
                     ((0, Mp - M), (0, Np - residual.shape[1])))
        in_specs.append(pl.BlockSpec((tm, tn), lambda j, i, k: (i, j)))
        args.append(rp)
        kernel = functools.partial(_mm_bias_res_kernel, relu=relu)
    else:
        kernel = functools.partial(_mm_bias_kernel, relu=relu)

    out = pl.pallas_call(
        kernel,
        out_shape=jax.ShapeDtypeStruct((Mp, Np), jnp.bfloat16),
        grid_spec=pltpu.PrefetchScalarGridSpec(
            num_scalar_prefetch=0,
            # N leads so deep layers (1 M-block) still expose >=2 parallel blocks
            # (v7x 2 TCs); K stays innermost "arbitrary" for the accumulator.
            grid=(Np // tn, Mp // tm, Kp // tk),
            in_specs=in_specs,
            out_specs=pl.BlockSpec((tm, tn), lambda j, i, k: (i, j)),
            scratch_shapes=[pltpu.VMEM((tm, tn), jnp.float32)],
        ),
        compiler_params=pltpu.CompilerParams(
            dimension_semantics=("parallel", "parallel", "arbitrary"),
            vmem_limit_bytes=32 * 1024 * 1024),
    )(*args)
    return out[:M, :wd['N']]


# ----------------------------------------------------------------------------
# Pallas kernel 2: fused global average pool + FC head
#   logits = mean(x, axis=HW) @ fc_w + fc_b      (tiny; whole-array, single call)
# ----------------------------------------------------------------------------
def _gap_fc_kernel(x_ref, w_ref, b_ref, o_ref):
    pooled = jnp.mean(x_ref[...].astype(jnp.float32), axis=1)        # [B, C]
    o_ref[...] = (jnp.dot(pooled, w_ref[...],
                          preferred_element_type=jnp.float32) + b_ref[...])


def gap_fc(x_nhwc, fc_w, fc_b, num_classes):
    B, H, W, C = x_nhwc.shape
    x3 = x_nhwc.reshape(B, H * W, C)
    ncp = fc_w.shape[1]
    out = pl.pallas_call(
        _gap_fc_kernel,
        out_shape=jax.ShapeDtypeStruct((B, ncp), jnp.float32),
    )(x3, fc_w, fc_b)
    return out[:, :num_classes]


# ----------------------------------------------------------------------------
# im2col (NHWC, bf16) -- glue feeding the fused matmul kernel.
# TODO(synk): fold the kh*kw taps into the matmul's K grid axis (read the padded
# activation once instead of kh*kw times); mitigated today by bf16 patches and by
# 3 of every 4 ResNet convs being 1x1 (no blow-up at all).
# ----------------------------------------------------------------------------
def im2col(x, kh, kw, stride, pad):
    B, H, W, C = x.shape
    xp = jnp.pad(x, ((0, 0), (pad, pad), (pad, pad), (0, 0)))
    Ho = (H + 2 * pad - kh) // stride + 1
    Wo = (W + 2 * pad - kw) // stride + 1
    if kh == 1 and kw == 1:
        patches = xp[:, 0:(Ho - 1) * stride + 1:stride,
                        0:(Wo - 1) * stride + 1:stride, :]
        return patches.reshape(B * Ho * Wo, C), Ho, Wo
    cols = []
    for i in range(kh):
        for j in range(kw):
            cols.append(xp[:, i:i + (Ho - 1) * stride + 1:stride,
                            j:j + (Wo - 1) * stride + 1:stride, :])
    patches = jnp.concatenate(cols, axis=-1)          # [B, Ho, Wo, kh*kw*C]
    return patches.reshape(B * Ho * Wo, kh * kw * C), Ho, Wo


def conv_bn_act(x_nhwc, wd, stride, pad, relu, residual=None):
    B = x_nhwc.shape[0]
    patches, Ho, Wo = im2col(x_nhwc, wd['kh'], wd['kw'], stride, pad)
    res2 = None
    if residual is not None:
        res2 = residual.reshape(B * Ho * Wo, residual.shape[-1])
    y = fused_matmul_bias(patches, wd, relu=relu, residual=res2)
    return y.reshape(B, Ho, Wo, wd['N'])


# ----------------------------------------------------------------------------
# 3x3/stride-2/pad-1 max-pool: fused chain of pairwise maxima over shifted
# strided views (no [9,M,C] HBM materialization; trivial VPU work, XLA fuses it).
# ----------------------------------------------------------------------------
def maxpool_3x3_s2_p1(x_nhwc):
    B, H, W, C = x_nhwc.shape
    k, stride, pad = 3, 2, 1
    Ho = (H + 2 * pad - k) // stride + 1
    Wo = (W + 2 * pad - k) // stride + 1
    pad_val = jnp.finfo(x_nhwc.dtype).min
    xp = jnp.pad(x_nhwc, ((0, 0), (pad, pad), (pad, pad), (0, 0)),
                 constant_values=pad_val)
    out = None
    for i in range(k):
        for j in range(k):
            tap = xp[:, i:i + (Ho - 1) * stride + 1:stride,
                        j:j + (Wo - 1) * stride + 1:stride, :]
            out = tap if out is None else jnp.maximum(out, tap)
    return out


# ----------------------------------------------------------------------------
# deterministic parameter construction (ResNet-50 shapes), weights prepped for
# the kernel ONCE here: [K,N] layout, BN *scale* folded into the bf16 weights,
# padded to the (tk, tn) tile grid; BN bias as padded f32 row.
# ----------------------------------------------------------------------------
class ParamGen:
    def __init__(self, seed=0):
        self.key = jax.random.PRNGKey(seed)
        self.count = 0

    def _next(self):
        self.count += 1
        return jax.random.fold_in(self.key, self.count)

    def conv(self, cout, cin, kh, kw):
        fan_in = cin * kh * kw
        return (jax.random.normal(self._next(), (cout, cin, kh, kw), jnp.float32)
                * (2.0 / fan_in) ** 0.5)

    def bn(self, c, eps=1e-5):
        gamma = 1.0 + 0.1 * jax.random.normal(self._next(), (c,), jnp.float32)
        beta = 0.1 * jax.random.normal(self._next(), (c,), jnp.float32)
        mean = 0.1 * jax.random.normal(self._next(), (c,), jnp.float32)
        var = 0.9 + 0.1 * jnp.abs(jax.random.normal(self._next(), (c,), jnp.float32))
        scale = gamma / jnp.sqrt(var + eps)   # fold BN (inference) into scale/bias
        bias = beta - mean * scale
        return scale, bias


def _fold_weight(w_oihw, scale):
    """[Cout,Cin,kh,kw] -> [kh*kw*Cin, Cout] with BN scale folded in (im2col order)."""
    cout, cin, kh, kw = w_oihw.shape
    w2 = jnp.transpose(w_oihw, (2, 3, 1, 0)).reshape(kh * kw * cin, cout)
    return w2 * scale[None, :]


def _finalize_pack(w2_kn, bias, kh, kw):
    K, N = w2_kn.shape
    tk = _pick_tk(K)
    tn = min(256, round_up(N, 128))
    Kp, Np = round_up(K, tk), round_up(N, tn)
    return {
        'w': jnp.pad(w2_kn.astype(jnp.bfloat16), ((0, Kp - K), (0, Np - N))),
        'b': jnp.pad(bias.astype(jnp.float32), (0, Np - N)).reshape(1, Np),
        'K': K, 'N': N, 'kh': kh, 'kw': kw, 'tk': tk, 'tn': tn,
    }


def _prep_conv_bn(pg, cout, cin, kh, kw):
    w = pg.conv(cout, cin, kh, kw)
    scale, bias = pg.bn(cout)
    return _finalize_pack(_fold_weight(w, scale), bias, kh, kw)


def _prep_conv3_plus_down(pg, planes, inplanes):
    # conv3 (1x1, planes->4p) and the downsample shortcut (1x1, inplanes->4p) share
    # Cout; with BN folded to per-channel affines,
    #   BN3(out@W3) + BNd(x@Wd) == [out|x] @ [[W3*s3],[Wd*sd]] + (b3+bd)
    # so the whole block tail (conv3+BN3 + downsample+BNd + add + ReLU) is ONE matmul.
    w3 = pg.conv(planes * 4, planes, 1, 1)
    s3, b3 = pg.bn(planes * 4)
    wd = pg.conv(planes * 4, inplanes, 1, 1)
    sd, bd = pg.bn(planes * 4)
    w2 = jnp.concatenate([_fold_weight(w3, s3), _fold_weight(wd, sd)], axis=0)
    return _finalize_pack(w2, b3 + bd, 1, 1)


def make_resnet50_params(num_classes=2, seed=0):
    pg = ParamGen(seed)
    params = {'stem': _prep_conv_bn(pg, 64, 3, 7, 7), 'layers': []}
    cfg = [(64, 3, 1), (128, 4, 2), (256, 6, 2), (512, 3, 2)]   # ResNet-50
    inplanes = 64
    for planes, blocks, stride in cfg:
        layer = []
        for b in range(blocks):
            s = stride if b == 0 else 1
            blk = {
                'conv1': _prep_conv_bn(pg, planes, inplanes, 1, 1),
                'conv2': _prep_conv_bn(pg, planes, planes, 3, 3),
                'stride': s,
            }
            if b == 0:
                blk['conv3_down'] = _prep_conv3_plus_down(pg, planes, inplanes)
            else:
                blk['conv3'] = _prep_conv_bn(pg, planes * 4, planes, 1, 1)
            layer.append(blk)
            inplanes = planes * 4
        params['layers'].append(layer)
    ncp = round_up(num_classes, 128)
    fc_w = 0.01 * jax.random.normal(pg._next(), (num_classes, 2048), jnp.float32)
    fc_b = jnp.zeros((num_classes,), jnp.float32)
    params['fc_w'] = jnp.pad(fc_w.T, ((0, 0), (0, ncp - num_classes)))     # [2048, ncp] f32
    params['fc_b'] = jnp.pad(fc_b, (0, ncp - num_classes)).reshape(1, ncp)
    params['num_classes'] = num_classes
    return params


# ----------------------------------------------------------------------------
# forward pass (== MedicalImageClassifier.forward, inference mode)
# ----------------------------------------------------------------------------
def bottleneck(x, blk):
    out = conv_bn_act(x, blk['conv1'], 1, 0, relu=True)
    out = conv_bn_act(out, blk['conv2'], blk['stride'], 1, relu=True)
    if 'conv3_down' in blk:
        # fused tail: [conv2_out | strided x] @ concat-weights + combined bias + ReLU
        s = blk['stride']
        xd = x if s == 1 else x[:, ::s, ::s, :]
        cat = jnp.concatenate([out, xd], axis=-1)
        return conv_bn_act(cat, blk['conv3_down'], 1, 0, relu=True)
    # identity block: conv3 + BN + residual add + ReLU fused into one kernel epilogue
    return conv_bn_act(out, blk['conv3'], 1, 0, relu=True, residual=x)


def medical_image_classifier_forward(params, x_nchw):
    # input NCHW (PyTorch) -> NHWC bf16 internally (channels on the lane axis)
    x = jnp.transpose(x_nchw, (0, 2, 3, 1)).astype(jnp.bfloat16)
    x = conv_bn_act(x, params['stem'], 2, 3, relu=True)
    x = maxpool_3x3_s2_p1(x)
    for layer in params['layers']:
        for blk in layer:
            x = bottleneck(x, blk)
    # Dropout(0.5) is identity at inference (eval mode); GAP + FC fused in one kernel.
    # TODO(synk): monte_carlo_inference / predict_with_uncertainty (stochastic
    # MC-dropout sampling) are not part of forward() and are not implemented here.
    logits = gap_fc(x, params['fc_w'], params['fc_b'], params['num_classes'])
    return logits                                    # [B, num_classes] float32


# ----------------------------------------------------------------------------
if __name__ == "__main__":
    key = jax.random.PRNGKey(0)
    x = jax.random.normal(key, (2, 3, 64, 64), jnp.float32)   # small NCHW image batch
    params = make_resnet50_params(num_classes=2, seed=0)

    logits = medical_image_classifier_forward(params, x)
    logits = jax.block_until_ready(logits)

    assert logits.shape == (2, 2), logits.shape
    assert bool(jnp.all(jnp.isfinite(logits)))
    print("KERNEL_OK")
</pallas_src>

<mosaic_0001>
module attributes {stable_mosaic.version = 11 : i64} {
  func.func @_mm_bias_kernel(%arg0: i32, %arg1: i32, %arg2: i32, %arg3: memref<256x256xbf16, #tpu.memory_space<vmem>>, %arg4: memref<256x128xbf16, #tpu.memory_space<vmem>>, %arg5: memref<1x128xf32, #tpu.memory_space<vmem>>, %arg6: memref<256x128xbf16, #tpu.memory_space<vmem>>, %arg7: memref<256x128xf32, #tpu.memory_space<vmem>>) attributes {dimension_semantics = [#tpu.dimension_semantics<parallel>, #tpu.dimension_semantics<parallel>, #tpu.dimension_semantics<arbitrary>], iteration_bounds = array<i64: 1, 8, 1>, scalar_prefetch = 0 : i64, scratch_operands = 1 : i64, tpu.core_type = #tpu.core_type<tc>, window_params = [{transform_indices = @transform_0, window_bounds = array<i64: 256, 256>}, {transform_indices = @transform_1, window_bounds = array<i64: 256, 128>}, {transform_indices = @transform_2, window_bounds = array<i64: 1, 128>}, {transform_indices = @transform_3, window_bounds = array<i64: 256, 128>}]} {
    %c0_i32 = arith.constant 0 : i32
    %0 = arith.cmpi eq, %arg2, %c0_i32 : i32
    %1 = arith.extui %0 : i1 to i32
    %c0_i32_0 = arith.constant 0 : i32
    %2 = arith.cmpi ne, %1, %c0_i32_0 : i32
    scf.if %2 {
      %cst_10 = arith.constant 0.000000e+00 : f32
      %12 = vector.broadcast %cst_10 : f32 to vector<256x128xf32>
      %c0_11 = arith.constant 0 : index
      %c0_12 = arith.constant 0 : index
      %13 = vector.load %arg7[%c0_11, %c0_12] : memref<256x128xf32, #tpu.memory_space<vmem>>, vector<256x128xf32>
      tpu.vector_store %arg7[%c0_11, %c0_12], %12 {strides = array<i32>} : memref<256x128xf32, #tpu.memory_space<vmem>>, vector<256x128xf32>,
    } else {
    }
    %c0 = arith.constant 0 : index
    %c0_1 = arith.constant 0 : index
    %3 = vector.load %arg7[%c0, %c0_1] : memref<256x128xf32, #tpu.memory_space<vmem>>, vector<256x128xf32>
    %c0_2 = arith.constant 0 : index
    %c0_3 = arith.constant 0 : index
    %4 = vector.load %arg3[%c0_2, %c0_3] : memref<256x256xbf16, #tpu.memory_space<vmem>>, vector<256x256xbf16>
    %c0_4 = arith.constant 0 : index
    %c0_5 = arith.constant 0 : index
    %5 = vector.load %arg4[%c0_4, %c0_5] : memref<256x128xbf16, #tpu.memory_space<vmem>>, vector<256x128xbf16>
    %cst = arith.constant dense<0.000000e+00> : vector<256x128xf32>
    %6 = tpu.matmul %4, %5, %cst {dimension_numbers = #tpu.dot_dimension_numbers<[1], [0], [0], [1], [0, 0, 1, 1], [], []>} : vector<256x256xbf16>, vector<256x128xbf16>, vector<256x128xf32> -> vector<256x128xf32>
    %7 = arith.addf %3, %6 : vector<256x128xf32>
    %c0_6 = arith.constant 0 : index
    %c0_7 = arith.constant 0 : index
    %8 = vector.load %arg7[%c0_6, %c0_7] : memref<256x128xf32, #tpu.memory_space<vmem>>, vector<256x128xf32>
    tpu.vector_store %arg7[%c0_6, %c0_7], %7 {strides = array<i32>} : memref<256x128xf32, #tpu.memory_space<vmem>>, vector<256x128xf32>,
    %c0_i32_8 = arith.constant 0 : i32
    %9 = arith.cmpi eq, %arg2, %c0_i32_8 : i32
    %10 = arith.extui %9 : i1 to i32
    %c0_i32_9 = arith.constant 0 : i32
    %11 = arith.cmpi ne, %10, %c0_i32_9 : i32
    scf.if %11 {
      %c0_10 = arith.constant 0 : index
      %c0_11 = arith.constant 0 : index
      %12 = vector.load %arg7[%c0_10, %c0_11] : memref<256x128xf32, #tpu.memory_space<vmem>>, vector<256x128xf32>
      %c0_12 = arith.constant 0 : index
      %c0_13 = arith.constant 0 : index
      %13 = vector.load %arg5[%c0_12, %c0_13] : memref<1x128xf32, #tpu.memory_space<vmem>>, vector<1x128xf32>
      %14 = vector.broadcast %13 : vector<1x128xf32> to vector<256x128xf32>
      %15 = arith.addf %12, %14 : vector<256x128xf32>
      %cst_14 = arith.constant 0.000000e+00 : f32
      %16 = vector.broadcast %cst_14 : f32 to vector<256x128xf32>
      %17 = arith.maximumf %15, %16 : vector<256x128xf32>
      %18 = arith.truncf %17 : vector<256x128xf32> to vector<256x128xbf16>
      %c0_15 = arith.constant 0 : index
      %c0_16 = arith.constant 0 : index
      %19 = vector.load %arg6[%c0_15, %c0_16] : memref<256x128xbf16, #tpu.memory_space<vmem>>, vector<256x128xbf16>
      tpu.vector_store %arg6[%c0_15, %c0_16], %18 {strides = array<i32>} : memref<256x128xbf16, #tpu.memory_space<vmem>>, vector<256x128xbf16>,
    } else {
    }
    return
  }
  func.func @transform_0(%arg0: i32, %arg1: i32, %arg2: i32) -> (i32, i32) {
    %c0_i32 = arith.constant 0 : i32
    return %arg1, %arg2 : i32, i32
  }
  func.func @transform_1(%arg0: i32, %arg1: i32, %arg2: i32) -> (i32, i32) {
    %c0_i32 = arith.constant 0 : i32
    return %arg2, %arg0 : i32, i32
  }
  func.func @transform_2(%arg0: i32, %arg1: i32, %arg2: i32) -> (i32, i32) {
    %c0_i32 = arith.constant 0 : i32
    %c0_i32_0 = arith.constant 0 : i32
    return %c0_i32, %arg0 : i32, i32
  }
  func.func @transform_3(%arg0: i32, %arg1: i32, %arg2: i32) -> (i32, i32) {
    %c0_i32 = arith.constant 0 : i32
    return %arg1, %arg0 : i32, i32
  }
}

</mosaic_0001>

<bundles_post_ra>
// kernel: tpu_custom_call.1
= control target key start
LH: loop header
LB: loop body
LE: loop exit
PB: predicated region body
PF: predicated region fallthrough
CT: control target
= control target key end

     0   :  { %8 = vsyncpa [#allocation4], 0  ;;  %s2209_s0 = inlined_call_operand.hbm [shape: bf16[2048,256], index: 0, kind: input, shape index: {}]   ;;  %s2210_s1 = inlined_call_operand.hbm [shape: bf16[256,128], index: 1, kind: input, shape index: {}]   ;;  %s2211_s2 = inlined_call_operand.vmem [shape: f32[1,128], index: 2, kind: input, shape index: {}]   ;;  %s2212_s3 = inlined_call_operand.hbm [shape: bf16[2048,128], index: 3, kind: output, shape index: {}]  }
   0x1   :  { %10 = vsyncpa [#allocation4 + $0x1], 0 }
   0x2   :  { %11 = vsyncpa [#allocation7], 0 }
   0x3   :  { %12 = vsyncpa [#allocation5], 0 }
   0x4   :  { %14 = vsyncpa [#allocation5 + $0x1], 0  ;;  %s1939_s12 = smov 0   ;;  %s1941_s13 = smov 0  }
   0x5   :  { %s1943_s14 = smov 0   ;;  %s1945_s15 = smov 0  }
   0x6   :  { %s1947_s16 = smov 0   ;;  %s1949_s17 = smov 0  }
   0x7 LB: > { %s1269_s18 = sadd.s32 4294967295, %s1908_s17   ;;  %s1270_s19 = sadd.s32 4294967294, %s1908_s17   ;;  %s1908_s17 = sphi %s1949_s17, %s20_s17   ;;  %s1904_s16 = sphi %s1947_s16, %s2229_s16   ;;  %s1900_s15 = sphi %s1945_s15, %s2228_s15   ;;  %s1896_s14 = sphi %s1943_s14, %s2227_s14   ;;  %s1892_s13 = sphi %s1941_s13, %s2226_s13   ;;  %s1888_s12 = sphi %s1939_s12, %s2225_s12  }
   0x8   : > { %p61_p0 = scmp.ne.s32.totalorder %s1892_s13, %s1888_s12  ;;  %p1973_p1 = scmp.eq.s32.totalorder %s1269_s18, 0 }
   0x9   : > { %p1977_p2 = scmp.eq.s32.totalorder %s1269_s18, 7  ;;  %p147_p3 = scmp.eq.s32.totalorder %s1270_s19, 7 }
   0xa   : > { %p1983_p4 = por %p1973_p1, %p61_p0  ;;  %p1271_p5 = scmp.ge.s32.totalorder %s1908_s17, 1 }
   0xb   : > { %p1988_p6 = por %p147_p3, %p61_p0  ;;  %p154_p7 = scmp.lt.s32.totalorder %s1908_s17, 9 }
   0xc   : > { %s1910_s25 = smov [#allocation6]   ;;  %s35_s28 = sadd.s32 1, %s1904_s16 }
   0xd   : > { %s2217_s23 = scalar_select %p1988_p6, 1, 0 }
   0xe   : > { %p1993_p8 = pnand %p1271_p5, %p154_p7  ;;  %s170_s26 = sshll.u32 %s1910_s25, 4  ;;  %s171_s26 = int_to_ptr.vmem [resolvable:$true] %s170_s26 }
   0xf   : > { %s1781_s29 = scalar_lea.vmem %s171_s26, 2048  ;;  %p1789_p3 = scmp.lt.s32.totalorder %s171_s26, %s171_s26 }
  0x10   : > { %p1635_p9 = pneg %p1993_p8  ;;  %p1782_p12 = scmp.ne.s32.totalorder %s171_s26, %s1781_s29 }
  0x11   : > { %p1790_p5 = scmp.lt.s32.totalorder %s1781_s29, %s1781_s29 }
  0x12   : > { %p2001_p10 = pnand %p1635_p9, %p1973_p1 }
  0x13   : > { %p1791_p7 = por %p1790_p5, %p1789_p3 }
  0x14   : > { %p1772_p11 = pneg %p2001_p10 }
  0x16   : > { %p1784_p13 = pnand %p1782_p12, %p1772_p11 }
  0x18   : > { %p1785_p0 = pneg %p1784_p13 }
  0x1a   : > { %p1792_p6 = pnand %p1791_p7, %p1785_p0 }
  0x1c   : > { %1795 = shalt.err (!%p1792_p6)
}
  0x1d   : > { %s1911_s30 = smov 64   ;;  %s1912_s4 = smov 4  }
  0x1e   : > { %1638 = dma.hbm_to_vmem [thread:$0]  (!%p2001_p10), %s2210_s1, 2048, %s171_s26, [#allocation7], %s1911_s30, %s1911_s30, %s1912_s4  }
  0x1f   : > { %p37_p9 = scmp.ge.s32.totalorder %s35_s28, 8  ;;  %s48_s7 = sadd.s32 1, %s1896_s14 }
  0x20   : > { %p55_p6 = scmp.ne.s32.totalorder %s1896_s14, %s1892_s13  ;;  %p56_p11 = scmp.eq.s32.totalorder %s1908_s17, 0 }
  0x21   : > { %s2231_s28 = smov (%p37_p9, %s35_s28), 0  ;;  %p1648_p0 = scmp.lt.s32.totalorder %s1908_s17, 8 }
  0x22   : > { %p2019_p12 = por %p56_p11, %p55_p6  ;;  %p2025_p13 = por %p1977_p2, %p55_p6 }
  0x23   : > { %s43_s10 = ssub.s32 %s1904_s16, %s2231_s28  ;;  %s190_s11 = sand.u32 1, %s1896_s14  }
  0x24   : > { %s2221_s9 = scalar_select %p2025_p13, 1, 0 }
  0x25   : > { %p46_p10 = scmp.eq.s32.totalorder %s43_s10, 0  ;;  %s1275_s18 = sshll.u32 %s190_s11, 8 }
  0x26   : > { %s1370_s25 = sshll.u32 %s1904_s16, 12  ;;  %s194_s30 = scalar_lea.vmem [#allocation3], %s1275_s18 }
  0x27   : > { %s2034_s19 = scalar_select %p46_p10, %s1896_s14, %s48_s7  }
  0x28   : > { %s203_s29 = scalar_lea.hbm %s2209_s0, %s1370_s25  ;;  %s204_s4 = sshll.u32 %s194_s30, 4  ;;  %s205_s4 = int_to_ptr.vmem [resolvable:$true] %s204_s4 }
  0x29   : > { %p2042_p2 = pnand %p1648_p0, %p2019_p12  ;;  %s191_s5 = scalar_lea.sflag [#allocation4], %s190_s11 }
  0x2a   : > { %s1809_s6 = scalar_lea.vmem %s205_s4, 4096  ;;  %s1913_s7 = smov [#allocation3]  }
  0x2b   : > { %p1798_p3 = pneg %p2042_p2  ;;  %p1810_p5 = scmp.ne.s32.totalorder %s205_s4, %s1809_s6 }
  0x2c   : > { %s1814_s10 = sshll.u32 %s1913_s7, 4  ;;  %s1815_s10 = int_to_ptr.vmem [resolvable:$false] %s1814_s10 }
  0x2d   : > { %p1812_p7 = pnand %p1810_p5, %p1798_p3  ;;  %s1816_s25 = scalar_lea.vmem %s1815_s10, 8192 }
  0x2e   : > { %p1817_p6 = scmp.lt.s32.totalorder %s205_s4, %s1815_s10  ;;  %p1818_p11 = scmp.lt.s32.totalorder %s1816_s25, %s1809_s6 }
  0x2f   : > { %p1813_p9 = pneg %p1812_p7 }
  0x30   : > { %p1819_p10 = por %p1818_p11, %p1817_p6 }
  0x32   : > { %p1820_p13 = pnand %p1819_p10, %p1813_p9 }
  0x34   : > { %1823 = shalt.err (!%p1820_p13)
}
  0x35   : > { %s1914_s8 = smov 128   ;;  %s1915_s18 = smov 8  }
  0x36   : > { %1642 = dma.hbm_to_vmem [thread:$0]  (!%p2042_p2), %s203_s29, 4096, %s205_s4, %s191_s5, %s1914_s8, %s1914_s8, %s1915_s18  }
  0x37   : > { %216 = sbr.rel (%p1993_p8) target bundleno = 373 (0x175), region = 32  ;;  %s2053_s11 = sand.u32 (!%p1993_p8), 1, %s1892_s13  }
  0x38   : > { %s1280_s26 = sshll.u32 (!%p1993_p8), %s2053_s11, 8  ;;  %s219_s27 = scalar_lea.sflag (!%p1993_p8), [#allocation4], %s2053_s11 }
  0x39   : > { %s2057_s30 = scalar_lea.vmem (!%p1993_p8), [#allocation3], %s1280_s26 }
  0x3c   : > { %1875 = dma.done.wait (%p1983_p4), %s219_s27, 4096  }
  0x3d   : > { %1877 = vsyncadd (%p1983_p4), %s219_s27, 4294963200 }
  0x3e   : > { %1879 = dma.done.wait (%p1973_p1), [#allocation7], 2048  }
  0x3f   : > { %1881 = vsyncadd (%p1973_p1), [#allocation7], 4294965248  ;;  %v1706_v0 = vld [vmem:[#allocation6 + $0x78] sm:$0xff]   ;;  %v1708_v2 = vld [vmem:[#allocation6 + $0x70] sm:$0xff]   ;;  %s1282_s24 = sshll.u32 %s2053_s11, 7  ;;  %s1403_s4 = sshll.u32 %s1900_s15, 11 }
  0x40   : > { %v1707_v1 = vld [vmem:[#allocation6 + $0x38] sm:$0xff]   ;;  %1499 = vmatprep.subr.bf16.mxu0 %v1706_v0  ;;  %1611 = vmatprep.subr.bf16.mxu1 %v1706_v0  ;;  %v1709_v3 = vld [vmem:[#allocation6 + $0x30] sm:$0xff]   ;;  %v1710_v4 = vld [vmem:[#allocation6 + $0x68] sm:$0xff]   ;;  %s2111_s29 = scalar_lea.vmem [#allocation8], %s1282_s24  ;;  %s2158_s7 = scalar_lea.hbm %s2212_s3, %s1403_s4 }
  0x41   : > { %1500 = vmatpush3.bf16.msra.mxu0 %v1707_v1  ;;  %1619 = vmatpush3.bf16.msra.mxu1 %v1707_v1  ;;  %v1711_v5 = vld [vmem:[#allocation6 + $0x28] sm:$0xff]   ;;  %v1712_v6 = vld [vmem:[#allocation6 + $0x60] sm:$0xff]   ;;  %v1714_v8 = vld [vmem:[#allocation6 + $0x58] sm:$0xff]   ;;  %s1154_s21 = sshll.u32 %s2111_s29, 4  ;;  %s1140_s15 = scalar_lea.sflag [#allocation5], %s2053_s11  ;;  %s2160_s21 = int_to_ptr.vmem [resolvable:$true] %s1154_s21 }
  0x42   : > { %1501 = vmatprep.subr.bf16.mxu0 %v1708_v2  ;;  %1612 = vmatprep.subr.bf16.mxu1 %v1708_v2  ;;  %v1713_v7 = vld [vmem:[#allocation6 + $0x20] sm:$0xff]   ;;  %v1715_v9 = vld [vmem:[#allocation6 + $0x18] sm:$0xff]   ;;  %v1716_v10 = vld [vmem:[#allocation6 + $0x50] sm:$0xff]   ;;  %s1824_s10 = scalar_lea.vmem %s2160_s21, 2048  ;;  %p2223_p4 = scmp.ne.s32.totalorder %s2221_s9, 0 }
  0x43   : > { %v1724_v11 = vld [vmem:[%s2057_s30 + $0x4] ss:$8 sps:$4 sm:$0xff]   ;;  %v1717_v13 = vld [vmem:[#allocation6 + $0x10] sm:$0xff]   ;;  %v1722_v18 = vld [vmem:[%s2057_s30] ss:$8 sps:$4 sm:$0xff]   ;;  %p1825_p1 = scmp.ne.s32.totalorder %s2160_s21, %s1824_s10  ;;  %s1916_s25 = smov [#allocation8]  }
  0x44   : > { %v1727_v12 = vld [vmem:[%s2057_s30 + $0x84] ss:$8 sps:$4 sm:$0xff]   ;;  %680 = vmatprep.mubr.bf16.mxu0 %v1724_v11  ;;  %v1725_v19 = vld [vmem:[%s2057_s30 + $0x80] ss:$8 sps:$4 sm:$0xff]   ;;  %v1728_v20 = vld [vmem:[%s2057_s30 + $0x14] ss:$8 sps:$4 sm:$0xff]  }
  0x45   : > { %1502 = vmatpush3.bf16.msra.mxu0 %v1709_v3  ;;  %1620 = vmatpush3.bf16.msra.mxu1 %v1709_v3  ;;  %v1718_v14 = vld [vmem:[#allocation6 + $0x48] sm:$0xff]   ;;  %v1720_v16 = vld [vmem:[#allocation6 + $0x40] sm:$0xff]   ;;  %v1730_v21 = vld [vmem:[%s2057_s30 + $0x94] ss:$8 sps:$4 sm:$0xff]   ;;  %p1826_p8 = pnand %p1825_p1, %p2223_p4  ;;  %s1828_s8 = sshll.u32 %s1916_s25, 4  ;;  %s1829_s8 = int_to_ptr.vmem [resolvable:$false] %s1828_s8 }
  0x46   : > { %1503 = vmatprep.subr.bf16.mxu0 %v1710_v4  ;;  %1613 = vmatprep.subr.bf16.mxu1 %v1710_v4  ;;  %v1719_v15 = vld [vmem:[#allocation6 + $0x8] sm:$0xff]   ;;  %v1721_v17 = vld [vmem:[#allocation6] sm:$0xff]   ;;  %v1732_v22 = vld [vmem:[%s2057_s30 + $0x10] ss:$8 sps:$4 sm:$0xff]   ;;  %s1830_s18 = scalar_lea.vmem %s1829_s8, 4096  ;;  %p1831_p13 = scmp.lt.s32.totalorder %s2160_s21, %s1829_s8 }
  0x47   : > { %744 = vmatprep.mubr.bf16.mxu1 %v1727_v12  ;;  %v1733_v23 = vld [vmem:[%s2057_s30 + $0x90] ss:$8 sps:$4 sm:$0xff]   ;;  %v1734_v24 = vld [vmem:[%s2057_s30 + $0x24] ss:$8 sps:$4 sm:$0xff]   ;;  %v1738_v26 = vld [vmem:[%s2057_s30 + $0x20] ss:$8 sps:$4 sm:$0xff]   ;;  %p1827_p12 = pneg %p1826_p8  ;;  %p1832_p0 = scmp.lt.s32.totalorder %s1830_s18, %s1824_s10 }
  0x48   : > { %v1736_v25 = vld [vmem:[%s2057_s30 + $0xa4] ss:$8 sps:$4 sm:$0xff]   ;;  %v1739_v27 = vld [vmem:[%s2057_s30 + $0xa0] ss:$8 sps:$4 sm:$0xff]   ;;  %v1740_v28 = vld [vmem:[%s2057_s30 + $0x34] ss:$8 sps:$4 sm:$0xff]  }
  0x49   : > { %1504 = vmatpush3.bf16.msra.mxu0 %v1711_v5  ;;  %1621 = vmatpush3.bf16.msra.mxu1 %v1711_v5  ;;  %v1742_v29 = vld [vmem:[%s2057_s30 + $0xb4] ss:$8 sps:$4 sm:$0xff]   ;;  %v1744_v30 = vld [vmem:[%s2057_s30 + $0x30] ss:$8 sps:$4 sm:$0xff]   ;;  %v1746_v32 = vld [vmem:[%s2057_s30 + $0x44] ss:$8 sps:$4 sm:$0xff]   ;;  %p1833_p2 = por %p1832_p0, %p1831_p13 }
  0x4a   : > { %1505 = vmatprep.subr.bf16.mxu0 %v1712_v6  ;;  %1614 = vmatprep.subr.bf16.mxu1 %v1712_v6  ;;  %v1745_v31 = vld [vmem:[%s2057_s30 + $0xb0] ss:$8 sps:$4 sm:$0xff]   ;;  %v1748_v33 = vld [vmem:[%s2057_s30 + $0xc4] ss:$8 sps:$4 sm:$0xff]   ;;  %v1750_v34 = vld [vmem:[%s2057_s30 + $0x40] ss:$8 sps:$4 sm:$0xff]  }
  0x4b   : > { %v1751_v35 = vld [vmem:[%s2057_s30 + $0xc0] ss:$8 sps:$4 sm:$0xff]   ;;  %v1752_v36 = vld [vmem:[%s2057_s30 + $0x54] ss:$8 sps:$4 sm:$0xff]   ;;  %v1756_v38 = vld [vmem:[%s2057_s30 + $0x50] ss:$8 sps:$4 sm:$0xff]   ;;  %p1834_p3 = pnand %p1833_p2, %p1827_p12 }
  0x4c   : > { %v1754_v37 = vld [vmem:[%s2057_s30 + $0xd4] ss:$8 sps:$4 sm:$0xff]   ;;  %v1757_v39 = vld [vmem:[%s2057_s30 + $0xd0] ss:$8 sps:$4 sm:$0xff]   ;;  %v1758_v40 = vld [vmem:[%s2057_s30 + $0x64] ss:$8 sps:$4 sm:$0xff]  }
  0x4d   : > { %1506 = vmatpush3.bf16.msra.mxu0 %v1713_v7  ;;  %1622 = vmatpush3.bf16.msra.mxu1 %v1713_v7  ;;  %v1760_v41 = vld [vmem:[%s2057_s30 + $0xe4] ss:$8 sps:$4 sm:$0xff]   ;;  %v1762_v42 = vld [vmem:[%s2057_s30 + $0x60] ss:$8 sps:$4 sm:$0xff]   ;;  %v1764_v44 = vld [vmem:[%s2057_s30 + $0x74] ss:$8 sps:$4 sm:$0xff]  }
  0x4e   : > { %1507 = vmatprep.subr.bf16.mxu0 %v1714_v8  ;;  %1615 = vmatprep.subr.bf16.mxu1 %v1714_v8  ;;  %v1763_v43 = vld [vmem:[%s2057_s30 + $0xe0] ss:$8 sps:$4 sm:$0xff]   ;;  %v1766_v45 = vld [vmem:[%s2057_s30 + $0xf4] ss:$8 sps:$4 sm:$0xff]   ;;  %v1768_v46 = vld [vmem:[%s2057_s30 + $0x70] ss:$8 sps:$4 sm:$0xff]  }
  0x4f   : > { %v1769_v47 = vld [vmem:[%s2057_s30 + $0xf0] ss:$8 sps:$4 sm:$0xff]   ;;  %v2102_v53 = vld [vmem:[%s2211_s2] ss:$0 sm:$0xff] }
  0x51   : > { %1508 = vmatpush3.bf16.msra.mxu0 %v1715_v9  ;;  %1623 = vmatpush3.bf16.msra.mxu1 %v1715_v9 }
  0x52   : > { %1509 = vmatprep.subr.bf16.mxu0 %v1716_v10  ;;  %1616 = vmatprep.subr.bf16.mxu1 %v1716_v10 }
  0x55   : > { %1510 = vmatpush3.bf16.msra.mxu0 %v1717_v13  ;;  %1624 = vmatpush3.bf16.msra.mxu1 %v1717_v13 }
  0x56   : > { %1511 = vmatprep.subr.bf16.mxu0 %v1718_v14  ;;  %1617 = vmatprep.subr.bf16.mxu1 %v1718_v14 }
  0x59   : > { %1512 = vmatpush3.bf16.msra.mxu0 %v1719_v15  ;;  %1625 = vmatpush3.bf16.msra.mxu1 %v1719_v15 }
  0x5a   : > { %1513 = vmatprep.subr.bf16.mxu0 %v1720_v16  ;;  %1618 = vmatprep.subr.bf16.mxu1 %v1720_v16 }
  0x5d   : > { %1514 = vmatpush3.bf16.msra.mxu0 %v1721_v17  ;;  %1626 = vmatpush3.bf16.msra.mxu1 %v1721_v17 }
  0x60   : > { %681 = vmatmul.mubr.bf16.vlgmr.msra.gmra.mxu0 %v1722_v18  ;;  %745 = vmatmul.mubr.bf16.vlgmr.msra.gmra.mxu1 %v1725_v19 }
  0x61   : > { %688 = vmatprep.mubr.bf16.mxu0 %v1728_v20  ;;  %752 = vmatprep.mubr.bf16.mxu1 %v1730_v21 }
  0x68   : > { %689 = vmatmul.mubr.bf16.gmra.mxu0 %v1732_v22  ;;  %753 = vmatmul.mubr.bf16.gmra.mxu1 %v1733_v23 }
  0x69   : > { %696 = vmatprep.mubr.bf16.mxu0 %v1734_v24  ;;  %760 = vmatprep.mubr.bf16.mxu1 %v1736_v25 }
  0x70   : > { %697 = vmatmul.mubr.bf16.gmra.mxu0 %v1738_v26  ;;  %761 = vmatmul.mubr.bf16.gmra.mxu1 %v1739_v27 }
  0x71   : > { %704 = vmatprep.mubr.bf16.mxu0 %v1740_v28  ;;  %768 = vmatprep.mubr.bf16.mxu1 %v1742_v29 }
  0x78   : > { %705 = vmatmul.mubr.bf16.gmra.mxu0 %v1744_v30  ;;  %769 = vmatmul.mubr.bf16.gmra.mxu1 %v1745_v31 }
  0x79   : > { %712 = vmatprep.mubr.bf16.mxu0 %v1746_v32  ;;  %776 = vmatprep.mubr.bf16.mxu1 %v1748_v33 }
  0x80   : > { %713 = vmatmul.mubr.bf16.gmra.mxu0 %v1750_v34  ;;  %777 = vmatmul.mubr.bf16.gmra.mxu1 %v1751_v35 }
  0x81   : > { %720 = vmatprep.mubr.bf16.mxu0 %v1752_v36  ;;  %784 = vmatprep.mubr.bf16.mxu1 %v1754_v37 }
  0x88   : > { %721 = vmatmul.mubr.bf16.gmra.mxu0 %v1756_v38  ;;  %785 = vmatmul.mubr.bf16.gmra.mxu1 %v1757_v39 }
  0x89   : > { %728 = vmatprep.mubr.bf16.mxu0 %v1758_v40  ;;  %792 = vmatprep.mubr.bf16.mxu1 %v1760_v41 }
  0x90   : > { %729 = vmatmul.mubr.bf16.gmra.mxu0 %v1762_v42  ;;  %793 = vmatmul.mubr.bf16.gmra.mxu1 %v1763_v43 }
  0x91   : > { %736 = vmatprep.mubr.bf16.mxu0 %v1764_v44  ;;  %800 = vmatprep.mubr.bf16.mxu1 %v1766_v45 }
  0x98   : > { %737 = vmatmul.mubr.bf16.gmra.mxu0 %v1768_v46  ;;  %801 = vmatmul.mubr.bf16.gmra.mxu1 %v1769_v47 }
 0x120   : > { %v1515_v48 = vpop.f32.mrf.mxu0  ;;  %v1563_v49 = vpop.f32.mrf.mxu1 }
 0x122   : > { %v1516_v50 = vpop.f32.mrf.mxu0  ;;  %v1564_v51 = vpop.f32.mrf.mxu1 }
 0x123   : > { %v1517_v52 = vadd.f32 %v1516_v50, %v1515_v48  ;;  %v1565_v54 = vadd.f32 %v1564_v51, %v1563_v49 }
 0x124   : > { %v1518_v55 = vpop.f32.mrf.mxu0  ;;  %v1566_v56 = vpop.f32.mrf.mxu1 }
 0x125   : > { %v915_v57 = vadd.f32 %v1517_v52, %v2102_v53  ;;  %v931_v58 = vadd.f32 %v1565_v54, %v2102_v53 }
 0x126   : > { %v1519_v59 = vpop.f32.mrf.mxu0  ;;  %v1567_v60 = vpop.f32.mrf.mxu1 }
 0x127   : > { %v1520_v61 = vadd.f32 %v1519_v59, %v1518_v55  ;;  %v1568_v62 = vadd.f32 %v1567_v60, %v1566_v56  ;;  %v947_v3 = vmax.f32 %v915_v57, 0.0  ;;  %v963_v4 = vmax.f32 %v931_v58, 0.0 }
 0x128   : > { %v1521_v63 = vpop.f32.mrf.mxu0  ;;  %v1569_v0 = vpop.f32.mrf.mxu1 }
 0x129   : > { %v916_v1 = vadd.f32 %v1520_v61, %v2102_v53  ;;  %v932_v2 = vadd.f32 %v1568_v62, %v2102_v53 }
 0x12a   : > { %v1522_v5 = vpop.f32.mrf.mxu0  ;;  %v1570_v6 = vpop.f32.mrf.mxu1 }
 0x12b   : > { %v948_v7 = vmax.f32 %v916_v1, 0.0  ;;  %v964_v8 = vmax.f32 %v932_v2, 0.0  ;;  %v1523_v9 = vadd.f32 %v1522_v5, %v1521_v63  ;;  %v1571_v10 = vadd.f32 %v1570_v6, %v1569_v0 }
 0x12c   : > { %v1524_v11 = vpop.f32.mrf.mxu0  ;;  %v1572_v12 = vpop.f32.mrf.mxu1 }
 0x12d   : > { %v1407_v13 = vpack.c.bf16 %v948_v7, %v947_v3  ;;  %v1447_v14 = vpack.c.bf16 %v964_v8, %v963_v4  ;;  %v917_v15 = vadd.f32 %v1523_v9, %v2102_v53  ;;  %v933_v16 = vadd.f32 %v1571_v10, %v2102_v53 }
 0x12e   : > { %v1525_v17 = vpop.f32.mrf.mxu0  ;;  %v1573_v18 = vpop.f32.mrf.mxu1 }
 0x12f   : > { %1408 = vst [vmem:[%s2111_s29] sm:$0xff] %v1407_v13   ;;  %1491 = vst [vmem:[%s2111_s29 + $0x40] sm:$0xff] %v1447_v14   ;;  %v1526_v19 = vadd.f32 %v1525_v17, %v1524_v11  ;;  %v1574_v20 = vadd.f32 %v1573_v18, %v1572_v12  ;;  %v949_v25 = vmax.f32 %v917_v15, 0.0  ;;  %v965_v26 = vmax.f32 %v933_v16, 0.0 }
 0x130   : > { %v1527_v21 = vpop.f32.mrf.mxu0  ;;  %v1575_v22 = vpop.f32.mrf.mxu1 }
 0x131   : > { %v918_v23 = vadd.f32 %v1526_v19, %v2102_v53  ;;  %v934_v24 = vadd.f32 %v1574_v20, %v2102_v53 }
 0x132   : > { %v1528_v27 = vpop.f32.mrf.mxu0  ;;  %v1576_v28 = vpop.f32.mrf.mxu1 }
 0x133   : > { %v950_v29 = vmax.f32 %v918_v23, 0.0  ;;  %v966_v30 = vmax.f32 %v934_v24, 0.0  ;;  %v1529_v31 = vadd.f32 %v1528_v27, %v1527_v21  ;;  %v1577_v32 = vadd.f32 %v1576_v28, %v1575_v22 }
 0x134   : > { %v1530_v33 = vpop.f32.mrf.mxu0  ;;  %v1578_v34 = vpop.f32.mrf.mxu1 }
 0x135   : > { %v1412_v35 = vpack.c.bf16 %v950_v29, %v949_v25  ;;  %v1452_v36 = vpack.c.bf16 %v966_v30, %v965_v26  ;;  %v919_v37 = vadd.f32 %v1529_v31, %v2102_v53  ;;  %v935_v38 = vadd.f32 %v1577_v32, %v2102_v53 }
 0x136   : > { %v1531_v39 = vpop.f32.mrf.mxu0  ;;  %v1579_v40 = vpop.f32.mrf.mxu1 }
 0x137   : > { %1484 = vst [vmem:[%s2111_s29 + $0x8] sm:$0xff] %v1412_v35   ;;  %1492 = vst [vmem:[%s2111_s29 + $0x48] sm:$0xff] %v1452_v36   ;;  %v1532_v41 = vadd.f32 %v1531_v39, %v1530_v33  ;;  %v1580_v42 = vadd.f32 %v1579_v40, %v1578_v34  ;;  %v951_v47 = vmax.f32 %v919_v37, 0.0  ;;  %v967_v48 = vmax.f32 %v935_v38, 0.0 }
 0x138   : > { %v1533_v43 = vpop.f32.mrf.mxu0  ;;  %v1581_v44 = vpop.f32.mrf.mxu1 }
 0x139   : > { %v920_v45 = vadd.f32 %v1532_v41, %v2102_v53  ;;  %v936_v46 = vadd.f32 %v1580_v42, %v2102_v53 }
 0x13a   : > { %v1534_v49 = vpop.f32.mrf.mxu0  ;;  %v1582_v50 = vpop.f32.mrf.mxu1 }
 0x13b   : > { %v952_v51 = vmax.f32 %v920_v45, 0.0  ;;  %v968_v52 = vmax.f32 %v936_v46, 0.0  ;;  %v1535_v54 = vadd.f32 %v1534_v49, %v1533_v43  ;;  %v1583_v55 = vadd.f32 %v1582_v50, %v1581_v44 }
 0x13c   : > { %v1536_v56 = vpop.f32.mrf.mxu0  ;;  %v1584_v57 = vpop.f32.mrf.mxu1 }
 0x13d   : > { %v1417_v58 = vpack.c.bf16 %v952_v51, %v951_v47  ;;  %v1457_v59 = vpack.c.bf16 %v968_v52, %v967_v48  ;;  %v921_v60 = vadd.f32 %v1535_v54, %v2102_v53  ;;  %v937_v61 = vadd.f32 %v1583_v55, %v2102_v53 }
 0x13e   : > { %v1537_v62 = vpop.f32.mrf.mxu0  ;;  %v1585_v63 = vpop.f32.mrf.mxu1 }
 0x13f   : > { %1485 = vst [vmem:[%s2111_s29 + $0x10] sm:$0xff] %v1417_v58   ;;  %1493 = vst [vmem:[%s2111_s29 + $0x50] sm:$0xff] %v1457_v59   ;;  %v1538_v0 = vadd.f32 %v1537_v62, %v1536_v56  ;;  %v1586_v1 = vadd.f32 %v1585_v63, %v1584_v57  ;;  %v953_v6 = vmax.f32 %v921_v60, 0.0  ;;  %v969_v7 = vmax.f32 %v937_v61, 0.0 }
 0x140   : > { %v1539_v2 = vpop.f32.mrf.mxu0  ;;  %v1587_v3 = vpop.f32.mrf.mxu1 }
 0x141   : > { %v922_v4 = vadd.f32 %v1538_v0, %v2102_v53  ;;  %v938_v5 = vadd.f32 %v1586_v1, %v2102_v53 }
 0x142   : > { %v1540_v8 = vpop.f32.mrf.mxu0  ;;  %v1588_v9 = vpop.f32.mrf.mxu1 }
 0x143   : > { %v954_v10 = vmax.f32 %v922_v4, 0.0  ;;  %v970_v11 = vmax.f32 %v938_v5, 0.0  ;;  %v1541_v12 = vadd.f32 %v1540_v8, %v1539_v2  ;;  %v1589_v13 = vadd.f32 %v1588_v9, %v1587_v3 }
 0x144   : > { %v1542_v14 = vpop.f32.mrf.mxu0  ;;  %v1590_v15 = vpop.f32.mrf.mxu1 }
 0x145   : > { %v1422_v16 = vpack.c.bf16 %v954_v10, %v953_v6  ;;  %v1462_v17 = vpack.c.bf16 %v970_v11, %v969_v7  ;;  %v923_v18 = vadd.f32 %v1541_v12, %v2102_v53  ;;  %v939_v19 = vadd.f32 %v1589_v13, %v2102_v53 }
 0x146   : > { %v1543_v20 = vpop.f32.mrf.mxu0  ;;  %v1591_v21 = vpop.f32.mrf.mxu1 }
 0x147   : > { %1486 = vst [vmem:[%s2111_s29 + $0x18] sm:$0xff] %v1422_v16   ;;  %1494 = vst [vmem:[%s2111_s29 + $0x58] sm:$0xff] %v1462_v17   ;;  %v1544_v22 = vadd.f32 %v1543_v20, %v1542_v14  ;;  %v1592_v23 = vadd.f32 %v1591_v21, %v1590_v15  ;;  %v955_v28 = vmax.f32 %v923_v18, 0.0  ;;  %v971_v29 = vmax.f32 %v939_v19, 0.0 }
 0x148   : > { %v1545_v24 = vpop.f32.mrf.mxu0  ;;  %v1593_v25 = vpop.f32.mrf.mxu1 }
 0x149   : > { %v924_v26 = vadd.f32 %v1544_v22, %v2102_v53  ;;  %v940_v27 = vadd.f32 %v1592_v23, %v2102_v53 }
 0x14a   : > { %v1546_v30 = vpop.f32.mrf.mxu0  ;;  %v1594_v31 = vpop.f32.mrf.mxu1 }
 0x14b   : > { %v956_v32 = vmax.f32 %v924_v26, 0.0  ;;  %v972_v33 = vmax.f32 %v940_v27, 0.0  ;;  %v1547_v34 = vadd.f32 %v1546_v30, %v1545_v24  ;;  %v1595_v35 = vadd.f32 %v1594_v31, %v1593_v25 }
 0x14c   : > { %v1548_v36 = vpop.f32.mrf.mxu0  ;;  %v1596_v37 = vpop.f32.mrf.mxu1 }
 0x14d   : > { %v1427_v38 = vpack.c.bf16 %v956_v32, %v955_v28  ;;  %v1467_v39 = vpack.c.bf16 %v972_v33, %v971_v29  ;;  %v925_v40 = vadd.f32 %v1547_v34, %v2102_v53  ;;  %v941_v41 = vadd.f32 %v1595_v35, %v2102_v53 }
 0x14e   : > { %v1549_v42 = vpop.f32.mrf.mxu0  ;;  %v1597_v43 = vpop.f32.mrf.mxu1 }
 0x14f   : > { %1487 = vst [vmem:[%s2111_s29 + $0x20] sm:$0xff] %v1427_v38   ;;  %1495 = vst [vmem:[%s2111_s29 + $0x60] sm:$0xff] %v1467_v39   ;;  %v1550_v44 = vadd.f32 %v1549_v42, %v1548_v36  ;;  %v1598_v45 = vadd.f32 %v1597_v43, %v1596_v37  ;;  %v957_v50 = vmax.f32 %v925_v40, 0.0  ;;  %v973_v51 = vmax.f32 %v941_v41, 0.0 }
 0x150   : > { %v1551_v46 = vpop.f32.mrf.mxu0  ;;  %v1599_v47 = vpop.f32.mrf.mxu1 }
 0x151   : > { %v926_v48 = vadd.f32 %v1550_v44, %v2102_v53  ;;  %v942_v49 = vadd.f32 %v1598_v45, %v2102_v53 }
 0x152   : > { %v1552_v52 = vpop.f32.mrf.mxu0  ;;  %v1600_v54 = vpop.f32.mrf.mxu1 }
 0x153   : > { %v958_v55 = vmax.f32 %v926_v48, 0.0  ;;  %v974_v56 = vmax.f32 %v942_v49, 0.0  ;;  %v1553_v57 = vadd.f32 %v1552_v52, %v1551_v46  ;;  %v1601_v58 = vadd.f32 %v1600_v54, %v1599_v47 }
 0x154   : > { %v1554_v59 = vpop.f32.mrf.mxu0  ;;  %v1602_v60 = vpop.f32.mrf.mxu1 }
 0x155   : > { %v1432_v61 = vpack.c.bf16 %v958_v55, %v957_v50  ;;  %v1472_v62 = vpack.c.bf16 %v974_v56, %v973_v51  ;;  %v927_v63 = vadd.f32 %v1553_v57, %v2102_v53  ;;  %v943_v0 = vadd.f32 %v1601_v58, %v2102_v53 }
 0x156   : > { %v1555_v1 = vpop.f32.mrf.mxu0  ;;  %v1603_v2 = vpop.f32.mrf.mxu1 }
 0x157   : > { %1488 = vst [vmem:[%s2111_s29 + $0x28] sm:$0xff] %v1432_v61   ;;  %1496 = vst [vmem:[%s2111_s29 + $0x68] sm:$0xff] %v1472_v62   ;;  %v1556_v3 = vadd.f32 %v1555_v1, %v1554_v59  ;;  %v1604_v4 = vadd.f32 %v1603_v2, %v1602_v60  ;;  %v959_v9 = vmax.f32 %v927_v63, 0.0  ;;  %v975_v10 = vmax.f32 %v943_v0, 0.0 }
 0x158   : > { %v1557_v5 = vpop.f32.mrf.mxu0  ;;  %v1605_v6 = vpop.f32.mrf.mxu1 }
 0x159   : > { %v928_v7 = vadd.f32 %v1556_v3, %v2102_v53  ;;  %v944_v8 = vadd.f32 %v1604_v4, %v2102_v53 }
 0x15a   : > { %v1558_v11 = vpop.f32.mrf.mxu0  ;;  %v1606_v12 = vpop.f32.mrf.mxu1 }
 0x15b   : > { %v960_v13 = vmax.f32 %v928_v7, 0.0  ;;  %v976_v14 = vmax.f32 %v944_v8, 0.0  ;;  %v1559_v15 = vadd.f32 %v1558_v11, %v1557_v5  ;;  %v1607_v16 = vadd.f32 %v1606_v12, %v1605_v6 }
 0x15c   : > { %v1560_v17 = vpop.f32.mrf.mxu0  ;;  %v1608_v18 = vpop.f32.mrf.mxu1 }
 0x15d   : > { %v1437_v19 = vpack.c.bf16 %v960_v13, %v959_v9  ;;  %v1477_v20 = vpack.c.bf16 %v976_v14, %v975_v10  ;;  %v929_v23 = vadd.f32 %v1559_v15, %v2102_v53  ;;  %v945_v24 = vadd.f32 %v1607_v16, %v2102_v53 }
 0x15e   : > { %v1561_v21 = vpop.f32.mrf.mxu0  ;;  %v1609_v22 = vpop.f32.mrf.mxu1 }
 0x15f   : > { %1489 = vst [vmem:[%s2111_s29 + $0x30] sm:$0xff] %v1437_v19   ;;  %1497 = vst [vmem:[%s2111_s29 + $0x70] sm:$0xff] %v1477_v20   ;;  %v1562_v25 = vadd.f32 %v1561_v21, %v1560_v17  ;;  %v1610_v26 = vadd.f32 %v1609_v22, %v1608_v18  ;;  %v961_v29 = vmax.f32 %v929_v23, 0.0  ;;  %v977_v30 = vmax.f32 %v945_v24, 0.0 }
 0x161   : > { %v930_v27 = vadd.f32 %v1562_v25, %v2102_v53  ;;  %v946_v28 = vadd.f32 %v1610_v26, %v2102_v53 }
 0x163   : > { %v962_v31 = vmax.f32 %v930_v27, 0.0  ;;  %v978_v32 = vmax.f32 %v946_v28, 0.0 }
 0x165   : > { %v1442_v33 = vpack.c.bf16 %v962_v31, %v961_v29  ;;  %v1482_v34 = vpack.c.bf16 %v978_v32, %v977_v30 }
 0x167   : > { %1490 = vst [vmem:[%s2111_s29 + $0x38] sm:$0xff] %v1442_v33   ;;  %1498 = vst [vmem:[%s2111_s29 + $0x78] sm:$0xff] %v1482_v34  }
 0x168   : > { %1837 = shalt.err (!%p1834_p3)
}
 0x169   : > { %s1838_s26 = scalar_lea.hbm %s2158_s7, 2048  ;;  %s1842_s20 = scalar_lea.hbm %s2212_s3, 16384 }
 0x16a   : > { %p1839_p5 = scmp.ne.s32.totalorder %s2158_s7, %s1838_s26  ;;  %p1843_p6 = scmp.lt.s32.totalorder %s2158_s7, %s2212_s3 }
 0x16b   : > { %p1844_p11 = scmp.lt.s32.totalorder %s1842_s20, %s1838_s26 }
 0x16c   : > { %p1840_p7 = pnand %p1839_p5, %p2223_p4 }
 0x16d   : > { %p1845_p10 = por %p1844_p11, %p1843_p6 }
 0x16e   : > { %p1841_p9 = pneg %p1840_p7 }
 0x170   : > { %p1846_p1 = pnand %p1845_p10, %p1841_p9 }
 0x172   : > { %1849 = shalt.err (!%p1846_p1)
}
 0x173   : > { %s1917_s29 = smov 64   ;;  %s1918_s4 = smov 4  }
 0x174   : > { %1633 = dma.vmem_to_hbm [thread:$0]  (%p2223_p4), %s2160_s21, 2048, %s2158_s7, %s1140_s15, %s1917_s29, %s1917_s29, %s1918_s4  }
 0x175 PF: > { %p1650_p8 = scmp.ge.s32.totalorder %s1908_s17, 2  ;;  %s1169_s5 = sand.u32 1, %s1888_s12  }
 0x176   : > { %p2224_p12 = scmp.ne.s32.totalorder %s2217_s23, 0  ;;  %s1170_s6 = scalar_lea.sflag [#allocation5], %s1169_s5 }
 0x178   : > { %p1644_p13 = pnand %p1650_p8, %p2224_p12 }
 0x17a   : > { %p1645_p0 = pneg %p1644_p13 }
 0x17c   : > { %1883 = dma.done.wait (%p1645_p0), %s1170_s6, 2048  }
 0x17d   : > { %1885 = vsyncadd (%p1645_p0), %s1170_s6, 4294965248  ;;  %s20_s17 = sadd.s32 1, %s1908_s17   ;;  %s2225_s12 = smov %s1892_s13 }
 0x17e   : > { %p17_p2 = scmp.ge.s32.totalorder %s20_s17, 10   ;;  %s2226_s13 = smov %s1896_s14 }
 0x17f   : > { %s2227_s14 = smov %s2034_s19  ;;  %s2228_s15 = smov %s1904_s16 }
 0x180   : > { %s2229_s16 = smov %s2231_s28  ;;  %19 = sbr.rel (!%p17_p2) target bundleno = 7 (0x7), region = 93 }
 0x185   :  { %1175 = vsyncpa [#allocation4], 1 }
 0x186   :  { %1177 = vsyncpa [#allocation4 + $0x1], 1 }
 0x187   :  { %1178 = vsyncpa [#allocation7], 1 }
 0x188   :  { %1179 = vsyncpa [#allocation5], 1 }
 0x189   :  { %1181 = vsyncpa [#allocation5 + $0x1], 1 }

</bundles_post_ra>
